<compile_context>
chip_gen: v7x
topology: tpu7x:2x2x1
jax: 0.10.0
libtpu: 0.0.40
codegen_flags: <defaults>
</compile_context>

<pallas_src>
import numpy as np
import jax
import jax.numpy as jnp
from jax import lax
from jax.experimental import pallas as pl
from jax.experimental.pallas import tpu as pltpu


# ---------------------------------------------------------------- helpers ----
def _div_const(x, c):
    """x // c for non-negative x; strength-reduced for power-of-two c."""
    if c == 1:
        return x
    if c & (c - 1) == 0:
        return jnp.right_shift(x, int(c).bit_length() - 1)
    return x // c


def _mod_const(x, c):
    """x % c for non-negative x; strength-reduced for power-of-two c."""
    if c & (c - 1) == 0:
        return jnp.bitwise_and(x, c - 1)
    return x % c


def _pick_tile(nrows_pad, max_tile=2048):
    """Largest multiple-of-128 divisor of nrows_pad, capped, preferring >= 2 grid
    steps (so both v7x TensorCores are used when the row count allows it)."""
    best = 128
    cap = min(nrows_pad // 2, max_tile)
    t = 128
    while t <= cap:
        if nrows_pad % t == 0:
            best = t
        t += 128
    return best


# ----------------------------------------------------------------- kernel ----
def _make_kernel(d, n_list, strides, tile_rows, M):
    n_list = tuple(int(v) for v in n_list)
    strides = tuple(int(v) for v in strides)

    def kernel(x_ref, *refs):
        g_refs = refs[:d]            # factor j, expanded + transposed: (M, n_j) f32
        out_ref = refs[d]            # (B, TN)
        base = pl.program_id(0) * tile_rows

        wt = None                    # (M, TN) product over tile-varying factors
        wconst = None                # (M, 1)  product over tile-constant factors

        for j in range(d):
            nk, sk = n_list[j], strides[j]
            gT = g_refs[j][...].astype(jnp.float32)                     # (M, nk)
            if sk % tile_rows == 0:
                # Row index of this factor is constant over the tile: select one
                # column of gT with a compare + lane reduce (VPU/XLU, no MXU).
                idx = _mod_const(_div_const(base, sk), nk)              # scalar
                lane = lax.broadcasted_iota(jnp.int32, (M, nk), 1)
                col = jnp.sum(jnp.where(lane == idx, gT, 0.0),
                              axis=1, keepdims=True)                    # (M, 1)
                wconst = col if wconst is None else wconst * col
            else:
                # In-kernel one-hot from iota (no HBM selector traffic), then an
                # MXU selection matmul in the lane-dense transposed layout.
                p = base + lax.broadcasted_iota(jnp.int32, (nk, tile_rows), 1)
                idx = _mod_const(_div_const(p, sk), nk)                 # (nk, TN)
                rows = lax.broadcasted_iota(jnp.int32, (nk, tile_rows), 0)
                onehot = (idx == rows).astype(jnp.float32)              # (nk, TN)
                ghatT = jnp.dot(gT, onehot,
                                preferred_element_type=jnp.float32)     # (M, TN)
                wt = ghatT if wt is None else wt * ghatT                # Hadamard KRP

        if wt is None:
            wt = jnp.broadcast_to(
                wconst if wconst is not None else jnp.float32(1.0),
                (M, tile_rows))
        elif wconst is not None:
            wt = wt * wconst                                            # lane broadcast

        # out[b, t] = sum_m x[b, m] * W^T[m, t]  -> plain NN matmul, lane-dense store
        x = x_ref[...].astype(jnp.float32)                              # (B, M)
        out = jnp.dot(x, wt, preferred_element_type=jnp.float32)        # (B, TN)
        out_ref[...] = out.astype(out_ref.dtype)

    return kernel


# ---------------------------------------------------------------- wrapper ----
def lro_contract(x, chain_factors_t, n_list, nrows):
    """Computes out[b, p] = sum_m x[b, m] * prod_j G_j[idx_j(p), m], where
    idx_j(p) = (p // stride_j) % n_j, stride_j = prod_{i<j} n_i (lower chain
    position varies fastest) and chain_factors_t[j] = G_j.T of shape (M, n_j)."""
    d = len(chain_factors_t)
    B, M = x.shape

    strides, acc = [], 1
    for nk in n_list:
        strides.append(acc)
        acc *= int(nk)
    assert acc == nrows

    nrows_pad = -(-nrows // 128) * 128       # pad so output stores are 128-multiples
    tile = _pick_tile(nrows_pad)
    grid = (nrows_pad // tile,)

    in_specs = [pl.BlockSpec((B, M), lambda i: (0, 0))]                 # x, grid-invariant
    for gT in chain_factors_t:
        in_specs.append(pl.BlockSpec(gT.shape, lambda i: (0, 0)))       # tiny, full blocks
    out_spec = pl.BlockSpec((B, tile), lambda i: (0, i))

    out = pl.pallas_call(
        _make_kernel(d, n_list, strides, tile, M),
        out_shape=jax.ShapeDtypeStruct((B, nrows_pad), jnp.float32),
        grid_spec=pltpu.PrefetchScalarGridSpec(
            num_scalar_prefetch=0,
            grid=grid,
            in_specs=in_specs,
            out_specs=out_spec,
        ),
        compiler_params=pltpu.CompilerParams(
            dimension_semantics=("parallel",)),
    )(x, *chain_factors_t)
    return out[:, :nrows]


# ----------------------------------------------------------------- module ----
class LROTensorPallas:
    """JAX/Pallas port of LROTensor (forward pass only)."""

    def __init__(self, n, lro_config, sample_axis=False, key=None):
        self.n = [int(v) for v in n]
        self.d = len(self.n)
        self.P = lro_config['P']
        assert 0 < self.P < self.d
        self.N = int(round(np.prod(self.n)))
        self.sample_axis = sample_axis
        self.L = [int(v) for v in lro_config['L']]
        self.R = len(self.L)
        self.M = int(round(sum(self.L)))

        if key is None:
            key = jax.random.PRNGKey(0)
        keys = jax.random.split(key, self.d)
        self.factors = []
        for k in range(self.d):
            shape = (self.n[k], self.M) if k < self.P else (self.n[k], self.R)
            # deterministic stand-in for .data.normal_()
            self.factors.append(jax.random.normal(keys[k], shape, jnp.float32))

    def hidden_dim(self):
        return self.M if self.sample_axis else None

    def _expanded_factor_t(self, k):
        f = self.factors[k]
        if k >= self.P:
            # hoisted column repeat_interleave (R -> M), done once in the wrapper
            f = jnp.repeat(f, np.array(self.L), axis=1, total_repeat_length=self.M)
        return f.T                                      # (M, n_k): lane-dense layout

    def forward(self, input=None, T=False, tensorize_output=False):
        assert (input is None) != self.sample_axis
        if self.sample_axis:
            ks = list(range(self.d))                    # full chain
            nrows = self.N
            x = jnp.asarray(input, jnp.float32)         # (batch, M)
        else:
            ks = list(range(1, self.d))                 # recover() stops before k == 0
            nrows = self.N // self.n[0]
            x = self.factors[0]                         # lhs of the final mm

        chain_t = [self._expanded_factor_t(k) for k in ks]
        n_list = [self.n[k] for k in ks]
        out = lro_contract(x, chain_t, n_list, nrows)

        if self.sample_axis:
            if tensorize_output:
                out = out.reshape((out.shape[0],) + tuple(self.n))
            return out                                  # (batch, N)
        out = out.reshape(-1)                           # flatten_torch(., use_batch=False)
        if tensorize_output:
            out = out.reshape(tuple(self.n))
        return out
        # TODO(synk): T=True path only transposes the pre-flatten/pre-contraction
        # matrix (trivial glue, no kernel impact); omitted here.


# ---------------- pure-JAX reference (mirrors the torch code path) ----------------
def _krp(A, B):
    I, Rc = A.shape
    J, _ = B.shape
    return (A[:, None, :] * B[None, :, :]).reshape(I * J, Rc)


def reference_recover(model, stop_at_zero):
    W = jnp.ones((1, model.R), jnp.float32)
    last = 0 if not stop_at_zero else 1
    for k in range(model.d - 1, last - 1, -1):
        W = _krp(W, model.factors[k])
        if k == model.P:
            W = jnp.repeat(W, np.array(model.L), axis=1, total_repeat_length=model.M)
    return W


def reference_forward_sample_axis(model, x):
    W = reference_recover(model, stop_at_zero=False)     # (N, M)
    return x @ W.T


def reference_forward_no_sample_axis(model):
    W = reference_recover(model, stop_at_zero=True)      # (N/n0, M)
    return (model.factors[0] @ W.T).reshape(-1)


if __name__ == "__main__":
    key = jax.random.PRNGKey(0)
    kparams, kx, kparams2, kx2 = jax.random.split(key, 4)

    # --- test 1: sample_axis=True : forward(input) = input @ recover().T ---------
    n = [4, 8, 16]                       # d = 3, N = 512
    lro_config = {'P': 1, 'L': [3, 5]}   # R = 2, M = 8
    batch = 2
    model = LROTensorPallas(n, lro_config, sample_axis=True, key=kparams)
    x = jax.random.normal(kx, (batch, model.M), jnp.float32)            # (2, 8)
    out = jax.block_until_ready(model.forward(x))
    ref = reference_forward_sample_axis(model, x)
    assert out.shape == (batch, model.N)
    np.testing.assert_allclose(np.asarray(out), np.asarray(ref), rtol=1e-4, atol=1e-4)

    # --- test 2: sample_axis=False : forward() = flatten(factors[0] @ chain.T) ---
    model0 = LROTensorPallas(n, lro_config, sample_axis=False, key=kparams)
    out0 = jax.block_until_ready(model0.forward())
    ref0 = reference_forward_no_sample_axis(model0)
    assert out0.shape == (model0.N,)
    np.testing.assert_allclose(np.asarray(out0), np.asarray(ref0), rtol=1e-4, atol=1e-4)

    # --- test 3: config that exercises the tile-constant factor path -------------
    n3 = [256, 2, 2]                     # strides [1, 256, 512]; TN=512 -> factor 2 constant
    model3 = LROTensorPallas(n3, lro_config, sample_axis=True, key=kparams2)
    x3 = jax.random.normal(kx2, (3, model3.M), jnp.float32)             # (3, 8)
    out3 = jax.block_until_ready(model3.forward(x3))
    ref3 = reference_forward_sample_axis(model3, x3)
    assert out3.shape == (3, model3.N)
    np.testing.assert_allclose(np.asarray(out3), np.asarray(ref3), rtol=1e-4, atol=1e-4)

    print("KERNEL_OK")
</pallas_src>

<mosaic_0001>
module attributes {stable_mosaic.version = 11 : i64} {
  func.func @kernel(%arg0: i32, %arg1: memref<2x8xf32, #tpu.memory_space<vmem>>, %arg2: memref<8x4xf32, #tpu.memory_space<vmem>>, %arg3: memref<8x8xf32, #tpu.memory_space<vmem>>, %arg4: memref<8x16xf32, #tpu.memory_space<vmem>>, %arg5: memref<2x256xf32, #tpu.memory_space<vmem>>) attributes {dimension_semantics = [#tpu.dimension_semantics<parallel>], iteration_bounds = array<i64: 2>, scalar_prefetch = 0 : i64, scratch_operands = 0 : i64, tpu.core_type = #tpu.core_type<tc>, window_params = [{pipeline_mode = #tpu.pipeline_mode<synchronous>, transform_indices = @transform_0, window_bounds = array<i64: 2, 8>}, {pipeline_mode = #tpu.pipeline_mode<synchronous>, transform_indices = @transform_1, window_bounds = array<i64: 8, 4>}, {pipeline_mode = #tpu.pipeline_mode<synchronous>, transform_indices = @transform_2, window_bounds = array<i64: 8, 8>}, {pipeline_mode = #tpu.pipeline_mode<synchronous>, transform_indices = @transform_3, window_bounds = array<i64: 8, 16>}, {transform_indices = @transform_4, window_bounds = array<i64: 2, 256>}]} {
    %c256_i32 = arith.constant 256 : i32
    %0 = arith.muli %arg0, %c256_i32 : i32
    %c0 = arith.constant 0 : index
    %c0_0 = arith.constant 0 : index
    %1 = vector.load %arg2[%c0, %c0_0] : memref<8x4xf32, #tpu.memory_space<vmem>>, vector<8x4xf32>
    %2 = tpu.iota {dimensions = array<i32: 1>} : vector<4x256xi32>
    %3 = vector.broadcast %0 : i32 to vector<4x256xi32>
    %4 = arith.addi %3, %2 : vector<4x256xi32>
    %c3_i32 = arith.constant 3 : i32
    %5 = vector.broadcast %c3_i32 : i32 to vector<4x256xi32>
    %6 = arith.andi %4, %5 : vector<4x256xi32>
    %7 = tpu.iota {dimensions = array<i32: 0>} : vector<4x256xi32>
    %8 = arith.cmpi eq, %6, %7 : vector<4x256xi32>
    %9 = arith.extui %8 : vector<4x256xi1> to vector<4x256xi32>
    %10 = arith.sitofp %9 : vector<4x256xi32> to vector<4x256xf32>
    %cst = arith.constant dense<0.000000e+00> : vector<8x256xf32>
    %11 = tpu.matmul %1, %10, %cst {dimension_numbers = #tpu.dot_dimension_numbers<[1], [0], [0], [1], [0, 0, 1, 1], [], []>} : vector<8x4xf32>, vector<4x256xf32>, vector<8x256xf32> -> vector<8x256xf32>
    %c0_1 = arith.constant 0 : index
    %c0_2 = arith.constant 0 : index
    %12 = vector.load %arg3[%c0_1, %c0_2] : memref<8x8xf32, #tpu.memory_space<vmem>>, vector<8x8xf32>
    %13 = tpu.iota {dimensions = array<i32: 1>} : vector<8x256xi32>
    %14 = vector.broadcast %0 : i32 to vector<8x256xi32>
    %15 = arith.addi %14, %13 : vector<8x256xi32>
    %c2_i32 = arith.constant 2 : i32
    %16 = vector.broadcast %c2_i32 : i32 to vector<8x256xi32>
    %17 = arith.shrsi %15, %16 : vector<8x256xi32>
    %c7_i32 = arith.constant 7 : i32
    %18 = vector.broadcast %c7_i32 : i32 to vector<8x256xi32>
    %19 = arith.andi %17, %18 : vector<8x256xi32>
    %20 = tpu.iota {dimensions = array<i32: 0>} : vector<8x256xi32>
    %21 = arith.cmpi eq, %19, %20 : vector<8x256xi32>
    %22 = arith.extui %21 : vector<8x256xi1> to vector<8x256xi32>
    %23 = arith.sitofp %22 : vector<8x256xi32> to vector<8x256xf32>
    %cst_3 = arith.constant dense<0.000000e+00> : vector<8x256xf32>
    %24 = tpu.matmul %12, %23, %cst_3 {dimension_numbers = #tpu.dot_dimension_numbers<[1], [0], [0], [1], [0, 0, 1, 1], [], []>} : vector<8x8xf32>, vector<8x256xf32>, vector<8x256xf32> -> vector<8x256xf32>
    %25 = arith.mulf %11, %24 : vector<8x256xf32>
    %c0_4 = arith.constant 0 : index
    %c0_5 = arith.constant 0 : index
    %26 = vector.load %arg4[%c0_4, %c0_5] : memref<8x16xf32, #tpu.memory_space<vmem>>, vector<8x16xf32>
    %27 = tpu.iota {dimensions = array<i32: 1>} : vector<16x256xi32>
    %28 = vector.broadcast %0 : i32 to vector<16x256xi32>
    %29 = arith.addi %28, %27 : vector<16x256xi32>
    %c5_i32 = arith.constant 5 : i32
    %30 = vector.broadcast %c5_i32 : i32 to vector<16x256xi32>
    %31 = arith.shrsi %29, %30 : vector<16x256xi32>
    %c15_i32 = arith.constant 15 : i32
    %32 = vector.broadcast %c15_i32 : i32 to vector<16x256xi32>
    %33 = arith.andi %31, %32 : vector<16x256xi32>
    %34 = tpu.iota {dimensions = array<i32: 0>} : vector<16x256xi32>
    %35 = arith.cmpi eq, %33, %34 : vector<16x256xi32>
    %36 = arith.extui %35 : vector<16x256xi1> to vector<16x256xi32>
    %37 = arith.sitofp %36 : vector<16x256xi32> to vector<16x256xf32>
    %cst_6 = arith.constant dense<0.000000e+00> : vector<8x256xf32>
    %38 = tpu.matmul %26, %37, %cst_6 {dimension_numbers = #tpu.dot_dimension_numbers<[1], [0], [0], [1], [0, 0, 1, 1], [], []>} : vector<8x16xf32>, vector<16x256xf32>, vector<8x256xf32> -> vector<8x256xf32>
    %39 = arith.mulf %25, %38 : vector<8x256xf32>
    %c0_7 = arith.constant 0 : index
    %c0_8 = arith.constant 0 : index
    %40 = vector.load %arg1[%c0_7, %c0_8] : memref<2x8xf32, #tpu.memory_space<vmem>>, vector<2x8xf32>
    %cst_9 = arith.constant dense<0.000000e+00> : vector<2x256xf32>
    %41 = tpu.matmul %40, %39, %cst_9 {dimension_numbers = #tpu.dot_dimension_numbers<[1], [0], [0], [1], [0, 0, 1, 1], [], []>} : vector<2x8xf32>, vector<8x256xf32>, vector<2x256xf32> -> vector<2x256xf32>
    %c0_10 = arith.constant 0 : index
    %c0_11 = arith.constant 0 : index
    %42 = vector.load %arg5[%c0_10, %c0_11] : memref<2x256xf32, #tpu.memory_space<vmem>>, vector<2x256xf32>
    tpu.vector_store %arg5[%c0_10, %c0_11], %41 {strides = array<i32>} : memref<2x256xf32, #tpu.memory_space<vmem>>, vector<2x256xf32>,
    return
  }
  func.func @transform_0(%arg0: i32) -> (i32, i32) {
    %c0_i32 = arith.constant 0 : i32
    %c0_i32_0 = arith.constant 0 : i32
    %c0_i32_1 = arith.constant 0 : i32
    return %c0_i32, %c0_i32_0 : i32, i32
  }
  func.func @transform_1(%arg0: i32) -> (i32, i32) {
    %c0_i32 = arith.constant 0 : i32
    %c0_i32_0 = arith.constant 0 : i32
    %c0_i32_1 = arith.constant 0 : i32
    return %c0_i32, %c0_i32_0 : i32, i32
  }
  func.func @transform_2(%arg0: i32) -> (i32, i32) {
    %c0_i32 = arith.constant 0 : i32
    %c0_i32_0 = arith.constant 0 : i32
    %c0_i32_1 = arith.constant 0 : i32
    return %c0_i32, %c0_i32_0 : i32, i32
  }
  func.func @transform_3(%arg0: i32) -> (i32, i32) {
    %c0_i32 = arith.constant 0 : i32
    %c0_i32_0 = arith.constant 0 : i32
    %c0_i32_1 = arith.constant 0 : i32
    return %c0_i32, %c0_i32_0 : i32, i32
  }
  func.func @transform_4(%arg0: i32) -> (i32, i32) {
    %c0_i32 = arith.constant 0 : i32
    %c0_i32_0 = arith.constant 0 : i32
    return %c0_i32, %arg0 : i32, i32
  }
}

</mosaic_0001>

<bundles_post_ra>
// kernel: tpu_custom_call.1
= control target key start
LH: loop header
LB: loop body
LE: loop exit
PB: predicated region body
PF: predicated region fallthrough
CT: control target
= control target key end

     0   :  { %9 = vsyncpa [#allocation3], 0  ;;  %s894_s0 = inlined_call_operand.vmem [shape: f32[2,8], index: 0, kind: input, shape index: {}]   ;;  %s895_s1 = inlined_call_operand.vmem [shape: f32[8,4], index: 1, kind: input, shape index: {}]   ;;  %s896_s2 = inlined_call_operand.vmem [shape: f32[8,8], index: 2, kind: input, shape index: {}]   ;;  %s897_s3 = inlined_call_operand.vmem [shape: f32[8,16], index: 3, kind: input, shape index: {}]   ;;  %s898_s4 = inlined_call_operand.hbm [shape: f32[2,512], index: 4, kind: output, shape index: {}]  }
   0x1   :  { %11 = vsyncpa [#allocation3 + $0x1], 0  ;;  %s780_s15 = smov 0   ;;  %s782_s16 = smov 0  }
   0x2   :  { %s784_s17 = smov 0   ;;  %s786_s18 = smov 0  }
   0x3 LB: > { %s801_s19 = sadd.s32 4294967295, %s749_s18   ;;  %s609_s20 = sadd.s32 4294967294, %s749_s18   ;;  %s749_s18 = sphi %s786_s18, %s904_s18   ;;  %s745_s17 = sphi %s784_s17, %s903_s17   ;;  %s741_s16 = sphi %s782_s16, %s902_s16   ;;  %s737_s15 = sphi %s780_s15, %s901_s15  }
   0x4   : > { %s805_s21 = sadd.s32 1, %s749_s18   ;;  %s108_s22 = sadd.s32 1, %s745_s17 }
   0x5   : > { %s105_s23 = ssub.s32 %s749_s18, %s805_s21  ;;  %p118_p0 = scmp.ne.s32.totalorder %s745_s17, %s741_s16 }
   0x6   : > { %p106_p1 = scmp.eq.s32.totalorder %s105_s23, 0  ;;  %p119_p2 = scmp.eq.s32.totalorder %s801_s19, 1 }
   0x7   : > { %p124_p3 = scmp.ne.s32.totalorder %s741_s16, %s737_s15  ;;  %p125_p4 = scmp.eq.s32.totalorder %s609_s20, 1 }
   0x8   : > { %s816_s24 = scalar_select %p106_p1, %s745_s17, %s108_s22  }
   0x9   : > { %p818_p5 = por %p119_p2, %p118_p0  ;;  %p822_p6 = por %p125_p4, %p124_p3 }
   0xa   : > { %p611_p7 = scmp.ge.s32.totalorder %s749_s18, 1  ;;  %p155_p8 = scmp.lt.s32.totalorder %s749_s18, 3 }
   0xc   : > { %p156_p9 = pnand %p611_p7, %p155_p8 }
   0xd   : > { %s613_s27 = sshll.u32 (!%p156_p9), %s801_s19, 8  ;;  %v179_v0 = vlaneseq (!%p156_p9)  ;;  %v751_v2 = vmov (!%p156_p9), 0.0   ;;  %vm199_vm0 = vcmask (!%p156_p9), 1043456   ;;  %vm195_vm2 = vcmask (!%p156_p9), 31744   ;;  %v178_v20 = vld [vmem:[%s895_s1] sm:$0xff] (!%p156_p9)  ;;  %s173_s10 = sand.u32 (!%p156_p9), 1, %s741_s16  }
   0xe   : > { %159 = sbr.rel (%p156_p9) target bundleno = 478 (0x1de), region = 36  ;;  %v182_v1 = vstv (!%p156_p9), %s613_s27  ;;  %270 = vmatprep.mubr.f32.mxu0 (!%p156_p9), %v751_v2  ;;  %356 = vmatprep.mubr.f32.mxu1 (!%p156_p9), %v751_v2  ;;  %v277_v22 = vld [vmem:[%s896_s2] sm:$0xff] (!%p156_p9)  ;;  %vm288_vm8 = vcmask (!%p156_p9), 64512   ;;  %v752_v23 = vmov (!%p156_p9), 1.0   ;;  %v753_v24 = vmov (!%p156_p9), 1.0|1.0  }
   0xf   : > { %v180_v3 = vand.u32 (!%p156_p9), 127, %v179_v0  ;;  %v188_v4 = vshrl.u32 (!%p156_p9), %v179_v0, 7  ;;  %v365_v25 = vld [vmem:[%s897_s3] sm:$0xff] (!%p156_p9)  ;;  %vm383_vm13 = vcmask (!%p156_p9), 130048   ;;  %s612_s11 = sshll.u32 (!%p156_p9), %s173_s10, 2  ;;  %s640_s12 = sshll.u32 (!%p156_p9), %s801_s19, 6 }
  0x10   : > { %v460_v36 = vld [vmem:[%s894_s0] sm:$0x3] (!%p156_p9)  ;;  %s175_s13 = scalar_lea.vmem (!%p156_p9), [#allocation2], %s612_s11  ;;  %s852_s23 = scalar_lea.hbm (!%p156_p9), %s898_s4, %s640_s12 }
  0x11   : > { %v181_v5 = vadd.s32 (!%p156_p9), 128, %v180_v3  ;;  %v183_v6 = vadd.s32 (!%p156_p9), %v182_v1, %v180_v3  ;;  %v370_v11 = vadd.s32 (!%p156_p9), 8, %v188_v4  ;;  %s562_s14 = sshll.u32 (!%p156_p9), %s175_s13, 4  ;;  %s548_s27 = scalar_lea.sflag (!%p156_p9), [#allocation3], %s173_s10  ;;  %s854_s14 = int_to_ptr.vmem [resolvable:$true] %s562_s14 }
  0x12   : > { %s687_s28 = scalar_lea.vmem (!%p156_p9), %s854_s14, 64  ;;  %s754_s19 = smov (!%p156_p9), [#allocation2]  }
  0x13   : > { %v184_v7 = vadd.s32 (!%p156_p9), %v182_v1, %v181_v5  ;;  %v185_v8 = vand.u32 (!%p156_p9), 3, %v183_v6  ;;  %v278_v9 = vshra.s32 (!%p156_p9), %v183_v6, 2  ;;  %v366_v10 = vshra.s32 (!%p156_p9), %v183_v6, 5  ;;  %p688_p10 = scmp.ne.s32.totalorder (!%p156_p9), %s854_s14, %s687_s28  ;;  %s691_s29 = sshll.u32 (!%p156_p9), %s754_s19, 4  ;;  %s692_s29 = int_to_ptr.vmem [resolvable:$false] %s691_s29 }
  0x14   : > { %s693_s30 = scalar_lea.vmem (!%p156_p9), %s692_s29, 128  ;;  %p694_p13 = scmp.lt.s32.totalorder (!%p156_p9), %s854_s14, %s692_s29 }
  0x15   : > { %v186_v12 = vand.u32 3, %v184_v7  ;;  %vm189_vm1 = vcmp.eq.s32.totalorder %v185_v8, %v188_v4  ;;  %v279_v13 = vshra.s32 %v184_v7, 2  ;;  %v280_v14 = vand.u32 7, %v278_v9  ;;  %p689_p11 = pnand %p688_p10, %p818_p5  ;;  %p695_p0 = scmp.lt.s32.totalorder %s693_s30, %s687_s28 }
  0x16   : > { %v367_v15 = vshra.s32 %v184_v7, 5  ;;  %v368_v16 = vand.u32 15, %v366_v10  ;;  %v614_v17 = vsel %vm189_vm1, 1.0, %v751_v2 }
  0x17   : > { %vm190_vm3 = vcmp.eq.s32.totalorder %v186_v12, %v188_v4  ;;  %v281_v18 = vand.u32 7, %v279_v13  ;;  %vm282_vm4 = vcmp.eq.s32.totalorder %v280_v14, %v188_v4  ;;  %p690_p12 = pneg %p689_p11  ;;  %p696_p1 = por %p695_p0, %p694_p13 }
  0x18   : > { %v615_v19 = vsel %vm190_vm3, 1.0, %v751_v2  ;;  %v369_v21 = vand.u32 15, %v367_v15  ;;  %vm371_vm5 = vcmp.eq.s32.totalorder %v368_v16, %v188_v4  ;;  %vm373_vm6 = vcmp.eq.s32.totalorder %v368_v16, %v370_v11 }
  0x19   : > { %616 = vmatprep.subr.msk.mxu0 %vm199_vm0, %v615_v19  ;;  %vm283_vm7 = vcmp.eq.s32.totalorder %v281_v18, %v188_v4  ;;  %vm643_vm11 = vmpackc.low %vm373_vm6, %vm371_vm5  ;;  %p697_p2 = pnand %p696_p1, %p690_p12 }
  0x1a   : > { %617 = vmatpush1.msk.msra.mxu0 %vm199_vm0, %v614_v17  ;;  %621 = vmatprep.subr.msk.mxu1 %vm283_vm7, %v752_v23  ;;  %vm372_vm9 = vcmp.eq.s32.totalorder %v369_v21, %v188_v4  ;;  %vm374_vm10 = vcmp.eq.s32.totalorder %v369_v21, %v370_v11 }
  0x1b   : > { %618 = vmatmul.mubr.msk.f32.vlgmr.msra.gmra.mrb[0].mxu0 %vm195_vm2, %v178_v20  ;;  %622 = vmatpush1.msk.msra.mxu1 %vm282_vm4, %v752_v23  ;;  %vm641_vm12 = vmpackc.low %vm374_vm10, %vm372_vm9 }
  0x1c   : > { %642 = vmatprep.subr.msk.bf16.mxu0 %vm641_vm12, %v753_v24  ;;  %623 = vmatmul.mubr.msk.f32.vlgmr.msra.gmra.mrb[0].mxu1 %vm288_vm8, %v277_v22 }
  0x1d   : > { %644 = vmatpush1.bf16.msk.msra.mxu0 %vm643_vm11, %v753_v24  ;;  %451 = vmatprep.mubr.f32.mxu0 %v751_v2 }
  0x1e   : > { %528 = vmatprep.mubr.f32.mxu1 %v751_v2 }
  0x20   : > { %632 = vmatmul.mubr.msk.f32.vlgmr.msra.gmra.mrb[2].mxu0 %vm383_vm13, %v365_v25 }
  0xee   : > { %v272_v26 = vpop.f32.mrb[0].mxu0 }
  0xef   : > { %v274_v27 = vpop.f32.mrb[1].mxu0  ;;  %v358_v28 = vpop.f32.mrb[0].mxu1 }
  0xf0   : > { %v363_v29 = vmul.f32 %v358_v28, %v272_v26  ;;  %v360_v30 = vpop.f32.mrb[1].mxu1 }
  0xf1   : > { %v364_v31 = vmul.f32 %v360_v30, %v274_v27 }
  0xf3   : > { %v453_v32 = vpop.f32.mrb[2].mxu0 }
  0xf4   : > { %v458_v33 = vmul.f32 %v453_v32, %v363_v29  ;;  %v455_v34 = vpop.f32.mrb[3].mxu0 }
  0xf5   : > { %v459_v35 = vmul.f32 %v455_v34, %v364_v31 }
  0xf7   : > { %464 = vmatprep.subr.mxu1 %v459_v35 }
  0xf8   : > { %465 = vmatpush1.msra.mxu1 %v458_v33 }
  0xf9   : > { %633 = vmatmul.mubr.msk.f32.vlgmr.msra.gmra.mrb[2].mxu1 %vm288_vm8, %v460_v36 }
 0x1cc   : > { %v530_v37 = vpop.f32.mrb[2].mxu1 }
 0x1cd   : > { %v532_v38 = vpop.f32.mrb[3].mxu1 }
 0x1ce   : > { %v537_v39 = vcombine.low %v530_v37, %v532_v38 }
 0x1d0   : > { %634 = vst.sshfl [vmem:[%s175_s13] sm:$0x33 pattern:$0x76325410] %v537_v39 }
 0x1d1   : > { %700 = shalt.err (!%p697_p2)
}
 0x1d2   : > { %s701_s5 = scalar_lea.hbm %s852_s23, 64  ;;  %s705_s8 = scalar_lea.hbm %s898_s4, 128 }
 0x1d3   : > { %p702_p3 = scmp.ne.s32.totalorder %s852_s23, %s701_s5  ;;  %p706_p8 = scmp.lt.u32.totalorder %s852_s23, %s898_s4 }
 0x1d4   : > { %p707_p9 = scmp.lt.u32.totalorder %s705_s8, %s701_s5  ;;  %p709_p11 = scmp.lt.u32.totalorder %s701_s5, %s852_s23 }
 0x1d5   : > { %p703_p4 = pnand %p702_p3, %p818_p5 }
 0x1d6   : > { %p708_p10 = por %p707_p9, %p706_p8 }
 0x1d7   : > { %p704_p7 = pneg %p703_p4 }
 0x1d8   : > { %p710_p12 = por %p709_p11, %p708_p10 }
 0x1da   : > { %p711_p13 = pnand %p710_p12, %p704_p7 }
 0x1dc   : > { %714 = shalt.err (!%p711_p13)
}
 0x1dd   : > { %645 = dma.vmem_to_hbm [thread:$0]  (%p818_p5), %s854_s14, 64, %s852_s23, %s548_s27  }
 0x1de PF: > { %p651_p0 = scmp.ge.s32.totalorder %s749_s18, 2  ;;  %s574_s11 = sand.u32 1, %s737_s15  }
 0x1df   : > { %s575_s12 = scalar_lea.sflag [#allocation3], %s574_s11 }
 0x1e0   : > { %p648_p1 = pnand %p651_p0, %p822_p6 }
 0x1e2   : > { %732 = dma.done.wait (!%p648_p1), %s575_s12, 64  }
 0x1e3   : > { %734 = vsyncadd (!%p648_p1), %s575_s12, 4294967232  ;;  %p14_p2 = scmp.ge.s32.totalorder %s805_s21, 4   ;;  %s901_s15 = smov %s741_s16 }
 0x1e4   : > { %s902_s16 = smov %s745_s17  ;;  %s903_s17 = smov %s816_s24 }
 0x1e5   : > { %s904_s18 = smov %s805_s21  ;;  %16 = sbr.rel (!%p14_p2) target bundleno = 3 (0x3), region = 68 }
 0x1ec   :  { %580 = vsyncpa [#allocation3], 1 }
 0x1ed   :  { %582 = vsyncpa [#allocation3 + $0x1], 1 }

</bundles_post_ra>
